<compile_context>
chip_gen: v7x
topology: tpu7x:2x2x1
jax: 0.10.0
libtpu: 0.0.40
codegen_flags: <defaults>
</compile_context>

<pallas_src>
import functools

import jax
import jax.numpy as jnp
from jax.experimental import pallas as pl
from jax.experimental.pallas import tpu as pltpu

LANE = 128     # TPU lane width; all feature dims padded to this
HIDDEN = 64    # module's hidden size (stored inside 128-wide padded weights)
A_PAD = 8      # action rows padded to a full sublane group


def _round_up(x, m):
    return ((x + m - 1) // m) * m


# ----------------------------- Pallas kernel --------------------------------
def _dynamics_residual_kernel(s_ref, a_ref, w1s_ref, w1a_ref, b1_ref,
                              w2_ref, b2_ref, w3_ref, b3_ref, o_ref,
                              *, num_actions):
    s = s_ref[...]                                  # (TB, 128) bf16, streamed
    ids = a_ref[...]                                # (TB, 1)   int32, streamed

    # fc1: state part on the MXU; action part = row-select of w1_action
    # (replaces the one-hot @ W1 matmul and the host-side concat entirely).
    h1 = jnp.dot(s, w1s_ref[...], preferred_element_type=jnp.float32)
    w1a = w1a_ref[...].astype(jnp.float32)          # (A_PAD, 128), tiny, resident
    for k in range(num_actions):                    # static tiny loop (VPU)
        h1 = h1 + (ids == k).astype(jnp.float32) * w1a[k]
    h1 = jnp.maximum(h1 + b1_ref[...], 0.0)         # bias + ReLU in f32

    # fc2
    h2 = jnp.dot(h1.astype(jnp.bfloat16), w2_ref[...],
                 preferred_element_type=jnp.float32)
    h2 = jnp.maximum(h2 + b2_ref[...], 0.0)

    # dyn_out (zero-initialized in the module, but kernel is general)
    out = jnp.dot(h2.astype(jnp.bfloat16), w3_ref[...],
                  preferred_element_type=jnp.float32)
    o_ref[...] = (out + b3_ref[...]).astype(o_ref.dtype)   # lane-dense store


# ------------------------------- Wrapper -------------------------------------
def dynamics_residual_forward(s, a, packed, *, block_b=256):
    """s: (B, in_dim) f32, a: (B,) int action indices, packed: pack_params()."""
    B, in_dim = s.shape
    num_actions = packed["num_actions"]
    out_dim = packed["out_dim"]

    tb = min(block_b, _round_up(B, 8))       # batch tile (multiple of 8)
    b_pad = _round_up(B, tb)

    # Pad activations to lane-dense shapes (zeros are inert through the MLP).
    s_p = jnp.zeros((b_pad, LANE), jnp.bfloat16)
    s_p = s_p.at[:B, :in_dim].set(s.astype(jnp.bfloat16))
    a_p = jnp.zeros((b_pad, 1), jnp.int32)
    a_p = a_p.at[:B, 0].set(a.astype(jnp.int32))

    grid = (b_pad // tb,)
    kernel = functools.partial(_dynamics_residual_kernel,
                               num_actions=num_actions)

    flops = 6 * b_pad * LANE * LANE + 2 * b_pad * LANE * num_actions
    bytes_accessed = (s_p.size * 2 + a_p.size * 4 + b_pad * LANE * 4
                      + 3 * LANE * LANE * 2 + A_PAD * LANE * 2 + 3 * LANE * 4)

    out_p = pl.pallas_call(
        kernel,
        out_shape=jax.ShapeDtypeStruct((b_pad, LANE), jnp.float32),
        grid=grid,
        in_specs=[
            pl.BlockSpec((tb, LANE), lambda i: (i, 0)),     # state (streamed)
            pl.BlockSpec((tb, 1), lambda i: (i, 0)),        # action ids (streamed)
            pl.BlockSpec((LANE, LANE), lambda i: (0, 0)),   # w1_state (resident)
            pl.BlockSpec((A_PAD, LANE), lambda i: (0, 0)),  # w1_action (resident)
            pl.BlockSpec((1, LANE), lambda i: (0, 0)),      # b1
            pl.BlockSpec((LANE, LANE), lambda i: (0, 0)),   # w2
            pl.BlockSpec((1, LANE), lambda i: (0, 0)),      # b2
            pl.BlockSpec((LANE, LANE), lambda i: (0, 0)),   # w3
            pl.BlockSpec((1, LANE), lambda i: (0, 0)),      # b3
        ],
        out_specs=pl.BlockSpec((tb, LANE), lambda i: (i, 0)),
        compiler_params=pltpu.CompilerParams(
            dimension_semantics=("parallel",)),
        cost_estimate=pl.CostEstimate(flops=flops, transcendentals=0,
                                      bytes_accessed=bytes_accessed),
    )(s_p, a_p, packed["w1s"], packed["w1a"], packed["b1"],
      packed["w2"], packed["b2"], packed["w3"], packed["b3"])

    return out_p[:B, :out_dim]


# ----------------------------- Parameter init --------------------------------
def init_params(key, in_dim, num_actions, out_dim, hidden=HIDDEN):
    """Logical (un-padded) params, stored as (in_features, out_features);
    mimics nn.Linear default init, with dyn_out zeroed per the module."""
    d_in = in_dim + num_actions
    k1, k2, k3, k4 = jax.random.split(key, 4)

    def uniform(k, shape, fan_in):
        bound = 1.0 / (float(fan_in) ** 0.5)
        return jax.random.uniform(k, shape, jnp.float32, -bound, bound)

    return {
        "w1": uniform(k1, (d_in, hidden), d_in),
        "b1": uniform(k2, (hidden,), d_in),
        "w2": uniform(k3, (hidden, hidden), hidden),
        "b2": uniform(k4, (hidden,), hidden),
        "w3": jnp.zeros((hidden, out_dim), jnp.float32),   # zero-init per module
        "b3": jnp.zeros((out_dim,), jnp.float32),
    }


def pack_params(params, in_dim, num_actions, out_dim, hidden=HIDDEN):
    """Pad once to 128-lane layout, split fc1 into state/action parts, cast
    matmul weights to bf16 (biases stay f32)."""
    w1, w2, w3 = params["w1"], params["w2"], params["w3"]
    b1, b2, b3 = params["b1"], params["b2"], params["b3"]

    w1s = jnp.zeros((LANE, LANE), jnp.bfloat16)
    w1s = w1s.at[:in_dim, :hidden].set(w1[:in_dim].astype(jnp.bfloat16))
    w1a = jnp.zeros((A_PAD, LANE), jnp.bfloat16)
    w1a = w1a.at[:num_actions, :hidden].set(w1[in_dim:].astype(jnp.bfloat16))
    w2p = jnp.zeros((LANE, LANE), jnp.bfloat16)
    w2p = w2p.at[:hidden, :hidden].set(w2.astype(jnp.bfloat16))
    w3p = jnp.zeros((LANE, LANE), jnp.bfloat16)
    w3p = w3p.at[:hidden, :out_dim].set(w3.astype(jnp.bfloat16))
    b1p = jnp.zeros((1, LANE), jnp.float32).at[0, :hidden].set(b1)
    b2p = jnp.zeros((1, LANE), jnp.float32).at[0, :hidden].set(b2)
    b3p = jnp.zeros((1, LANE), jnp.float32).at[0, :out_dim].set(b3)

    return {"w1s": w1s, "w1a": w1a, "b1": b1p, "w2": w2p, "b2": b2p,
            "w3": w3p, "b3": b3p,
            "in_dim": in_dim, "num_actions": num_actions, "out_dim": out_dim}


# ------------------------------- Reference -----------------------------------
def reference_forward(s, a, params):
    num_actions = params["w1"].shape[0] - s.shape[1]
    one_hot = jax.nn.one_hot(a, num_actions, dtype=s.dtype)
    x = jnp.concatenate([s, one_hot], axis=1)
    h1 = jnp.maximum(x @ params["w1"] + params["b1"], 0.0)
    h2 = jnp.maximum(h1 @ params["w2"] + params["b2"], 0.0)
    return h2 @ params["w3"] + params["b3"]


if __name__ == "__main__":
    # Shapes consistent with the pr2_7d module: 7-d state, 4 actions, 7-d out.
    B, IN_DIM, NUM_ACTIONS, OUT_DIM = 8, 7, 4, 7

    key = jax.random.PRNGKey(0)
    k_s, k_a, k_p, k_w3, k_b3, k_s2, k_a2 = jax.random.split(key, 7)

    s = jax.random.normal(k_s, (B, IN_DIM), jnp.float32)
    a = jax.random.randint(k_a, (B,), 0, NUM_ACTIONS, jnp.int32)

    # Check 1: module as specified (zero-initialized dyn_out head).
    params = init_params(k_p, IN_DIM, NUM_ACTIONS, OUT_DIM)
    packed = pack_params(params, IN_DIM, NUM_ACTIONS, OUT_DIM)
    out = jax.block_until_ready(dynamics_residual_forward(s, a, packed))
    ref = reference_forward(s, a, params)
    assert out.shape == (B, OUT_DIM)
    assert jnp.allclose(out, ref, atol=5e-2, rtol=5e-2)

    # Check 2: non-zero head + batch that exercises the multi-tile grid path
    # (B=40 with block_b=16 -> padded to 48, grid of 3 tiles).
    params2 = dict(params)
    params2["w3"] = jax.random.uniform(k_w3, (HIDDEN, OUT_DIM), jnp.float32,
                                       -0.125, 0.125)
    params2["b3"] = jax.random.uniform(k_b3, (OUT_DIM,), jnp.float32,
                                       -0.125, 0.125)
    packed2 = pack_params(params2, IN_DIM, NUM_ACTIONS, OUT_DIM)

    B2 = 40
    s2 = jax.random.normal(k_s2, (B2, IN_DIM), jnp.float32)
    a2 = jax.random.randint(k_a2, (B2,), 0, NUM_ACTIONS, jnp.int32)
    out2 = jax.block_until_ready(
        dynamics_residual_forward(s2, a2, packed2, block_b=16))
    ref2 = reference_forward(s2, a2, params2)
    assert out2.shape == (B2, OUT_DIM)
    assert jnp.allclose(out2, ref2, atol=5e-2, rtol=5e-2)  # bf16 MXU operands

    print("KERNEL_OK")
</pallas_src>

<mosaic_0001>
module attributes {stable_mosaic.version = 11 : i64} {
  func.func @_dynamics_residual_kernel(%arg0: i32, %arg1: memref<8x128xbf16, #tpu.memory_space<vmem>>, %arg2: memref<8x1xi32, #tpu.memory_space<vmem>>, %arg3: memref<128x128xbf16, #tpu.memory_space<vmem>>, %arg4: memref<8x128xbf16, #tpu.memory_space<vmem>>, %arg5: memref<1x128xf32, #tpu.memory_space<vmem>>, %arg6: memref<128x128xbf16, #tpu.memory_space<vmem>>, %arg7: memref<1x128xf32, #tpu.memory_space<vmem>>, %arg8: memref<128x128xbf16, #tpu.memory_space<vmem>>, %arg9: memref<1x128xf32, #tpu.memory_space<vmem>>, %arg10: memref<8x128xf32, #tpu.memory_space<vmem>>) attributes {dimension_semantics = [#tpu.dimension_semantics<parallel>], iteration_bounds = array<i64: 1>, scalar_prefetch = 0 : i64, scratch_operands = 0 : i64, tpu.core_type = #tpu.core_type<tc>, window_params = [{transform_indices = @transform_0, window_bounds = array<i64: 8, 128>}, {transform_indices = @transform_1, window_bounds = array<i64: 8, 1>}, {pipeline_mode = #tpu.pipeline_mode<synchronous>, transform_indices = @transform_2, window_bounds = array<i64: 128, 128>}, {pipeline_mode = #tpu.pipeline_mode<synchronous>, transform_indices = @transform_3, window_bounds = array<i64: 8, 128>}, {pipeline_mode = #tpu.pipeline_mode<synchronous>, transform_indices = @transform_4, window_bounds = array<i64: 1, 128>}, {pipeline_mode = #tpu.pipeline_mode<synchronous>, transform_indices = @transform_5, window_bounds = array<i64: 128, 128>}, {pipeline_mode = #tpu.pipeline_mode<synchronous>, transform_indices = @transform_6, window_bounds = array<i64: 1, 128>}, {pipeline_mode = #tpu.pipeline_mode<synchronous>, transform_indices = @transform_7, window_bounds = array<i64: 128, 128>}, {pipeline_mode = #tpu.pipeline_mode<synchronous>, transform_indices = @transform_8, window_bounds = array<i64: 1, 128>}, {transform_indices = @transform_9, window_bounds = array<i64: 8, 128>}]} {
    %c0 = arith.constant 0 : index
    %c0_0 = arith.constant 0 : index
    %0 = vector.load %arg1[%c0, %c0_0] : memref<8x128xbf16, #tpu.memory_space<vmem>>, vector<8x128xbf16>
    %c0_1 = arith.constant 0 : index
    %c0_2 = arith.constant 0 : index
    %1 = vector.load %arg2[%c0_1, %c0_2] : memref<8x1xi32, #tpu.memory_space<vmem>>, vector<8x1xi32>
    %c0_3 = arith.constant 0 : index
    %c0_4 = arith.constant 0 : index
    %2 = vector.load %arg3[%c0_3, %c0_4] : memref<128x128xbf16, #tpu.memory_space<vmem>>, vector<128x128xbf16>
    %cst = arith.constant dense<0.000000e+00> : vector<8x128xf32>
    %3 = tpu.matmul %0, %2, %cst {dimension_numbers = #tpu.dot_dimension_numbers<[1], [0], [0], [1], [0, 0, 1, 1], [], []>} : vector<8x128xbf16>, vector<128x128xbf16>, vector<8x128xf32> -> vector<8x128xf32>
    %c0_5 = arith.constant 0 : index
    %c0_6 = arith.constant 0 : index
    %4 = vector.load %arg4[%c0_5, %c0_6] : memref<8x128xbf16, #tpu.memory_space<vmem>>, vector<8x128xbf16>
    %5 = arith.extf %4 : vector<8x128xbf16> to vector<8x128xf32>
    %c0_i32 = arith.constant 0 : i32
    %6 = vector.broadcast %c0_i32 : i32 to vector<8x1xi32>
    %7 = arith.cmpi eq, %1, %6 : vector<8x1xi32>
    %8 = arith.extui %7 : vector<8x1xi1> to vector<8x1xi32>
    %9 = arith.sitofp %8 : vector<8x1xi32> to vector<8x1xf32>
    %10 = vector.extract_strided_slice %5 {offsets = [0, 0], sizes = [1, 128], strides = [1, 1]} : vector<8x128xf32> to vector<1x128xf32>
    %11 = vector.shape_cast %10 : vector<1x128xf32> to vector<128xf32>
    %12 = vector.shape_cast %11 : vector<128xf32> to vector<1x128xf32>
    %13 = vector.broadcast %9 : vector<8x1xf32> to vector<8x128xf32>
    %14 = vector.broadcast %12 : vector<1x128xf32> to vector<8x128xf32>
    %15 = arith.mulf %13, %14 : vector<8x128xf32>
    %16 = arith.addf %3, %15 : vector<8x128xf32>
    %c1_i32 = arith.constant 1 : i32
    %17 = vector.broadcast %c1_i32 : i32 to vector<8x1xi32>
    %18 = arith.cmpi eq, %1, %17 : vector<8x1xi32>
    %19 = arith.extui %18 : vector<8x1xi1> to vector<8x1xi32>
    %20 = arith.sitofp %19 : vector<8x1xi32> to vector<8x1xf32>
    %21 = vector.extract_strided_slice %5 {offsets = [1, 0], sizes = [1, 128], strides = [1, 1]} : vector<8x128xf32> to vector<1x128xf32>
    %22 = vector.shape_cast %21 : vector<1x128xf32> to vector<128xf32>
    %23 = vector.shape_cast %22 : vector<128xf32> to vector<1x128xf32>
    %24 = vector.broadcast %20 : vector<8x1xf32> to vector<8x128xf32>
    %25 = vector.broadcast %23 : vector<1x128xf32> to vector<8x128xf32>
    %26 = arith.mulf %24, %25 : vector<8x128xf32>
    %27 = arith.addf %16, %26 : vector<8x128xf32>
    %c2_i32 = arith.constant 2 : i32
    %28 = vector.broadcast %c2_i32 : i32 to vector<8x1xi32>
    %29 = arith.cmpi eq, %1, %28 : vector<8x1xi32>
    %30 = arith.extui %29 : vector<8x1xi1> to vector<8x1xi32>
    %31 = arith.sitofp %30 : vector<8x1xi32> to vector<8x1xf32>
    %32 = vector.extract_strided_slice %5 {offsets = [2, 0], sizes = [1, 128], strides = [1, 1]} : vector<8x128xf32> to vector<1x128xf32>
    %33 = vector.shape_cast %32 : vector<1x128xf32> to vector<128xf32>
    %34 = vector.shape_cast %33 : vector<128xf32> to vector<1x128xf32>
    %35 = vector.broadcast %31 : vector<8x1xf32> to vector<8x128xf32>
    %36 = vector.broadcast %34 : vector<1x128xf32> to vector<8x128xf32>
    %37 = arith.mulf %35, %36 : vector<8x128xf32>
    %38 = arith.addf %27, %37 : vector<8x128xf32>
    %c3_i32 = arith.constant 3 : i32
    %39 = vector.broadcast %c3_i32 : i32 to vector<8x1xi32>
    %40 = arith.cmpi eq, %1, %39 : vector<8x1xi32>
    %41 = arith.extui %40 : vector<8x1xi1> to vector<8x1xi32>
    %42 = arith.sitofp %41 : vector<8x1xi32> to vector<8x1xf32>
    %43 = vector.extract_strided_slice %5 {offsets = [3, 0], sizes = [1, 128], strides = [1, 1]} : vector<8x128xf32> to vector<1x128xf32>
    %44 = vector.shape_cast %43 : vector<1x128xf32> to vector<128xf32>
    %45 = vector.shape_cast %44 : vector<128xf32> to vector<1x128xf32>
    %46 = vector.broadcast %42 : vector<8x1xf32> to vector<8x128xf32>
    %47 = vector.broadcast %45 : vector<1x128xf32> to vector<8x128xf32>
    %48 = arith.mulf %46, %47 : vector<8x128xf32>
    %49 = arith.addf %38, %48 : vector<8x128xf32>
    %c0_7 = arith.constant 0 : index
    %c0_8 = arith.constant 0 : index
    %50 = vector.load %arg5[%c0_7, %c0_8] : memref<1x128xf32, #tpu.memory_space<vmem>>, vector<1x128xf32>
    %51 = vector.broadcast %50 : vector<1x128xf32> to vector<8x128xf32>
    %52 = arith.addf %49, %51 : vector<8x128xf32>
    %cst_9 = arith.constant 0.000000e+00 : f32
    %53 = vector.broadcast %cst_9 : f32 to vector<8x128xf32>
    %54 = arith.maximumf %52, %53 : vector<8x128xf32>
    %55 = arith.truncf %54 : vector<8x128xf32> to vector<8x128xbf16>
    %c0_10 = arith.constant 0 : index
    %c0_11 = arith.constant 0 : index
    %56 = vector.load %arg6[%c0_10, %c0_11] : memref<128x128xbf16, #tpu.memory_space<vmem>>, vector<128x128xbf16>
    %cst_12 = arith.constant dense<0.000000e+00> : vector<8x128xf32>
    %57 = tpu.matmul %55, %56, %cst_12 {dimension_numbers = #tpu.dot_dimension_numbers<[1], [0], [0], [1], [0, 0, 1, 1], [], []>} : vector<8x128xbf16>, vector<128x128xbf16>, vector<8x128xf32> -> vector<8x128xf32>
    %c0_13 = arith.constant 0 : index
    %c0_14 = arith.constant 0 : index
    %58 = vector.load %arg7[%c0_13, %c0_14] : memref<1x128xf32, #tpu.memory_space<vmem>>, vector<1x128xf32>
    %59 = vector.broadcast %58 : vector<1x128xf32> to vector<8x128xf32>
    %60 = arith.addf %57, %59 : vector<8x128xf32>
    %cst_15 = arith.constant 0.000000e+00 : f32
    %61 = vector.broadcast %cst_15 : f32 to vector<8x128xf32>
    %62 = arith.maximumf %60, %61 : vector<8x128xf32>
    %63 = arith.truncf %62 : vector<8x128xf32> to vector<8x128xbf16>
    %c0_16 = arith.constant 0 : index
    %c0_17 = arith.constant 0 : index
    %64 = vector.load %arg8[%c0_16, %c0_17] : memref<128x128xbf16, #tpu.memory_space<vmem>>, vector<128x128xbf16>
    %cst_18 = arith.constant dense<0.000000e+00> : vector<8x128xf32>
    %65 = tpu.matmul %63, %64, %cst_18 {dimension_numbers = #tpu.dot_dimension_numbers<[1], [0], [0], [1], [0, 0, 1, 1], [], []>} : vector<8x128xbf16>, vector<128x128xbf16>, vector<8x128xf32> -> vector<8x128xf32>
    %c0_19 = arith.constant 0 : index
    %c0_20 = arith.constant 0 : index
    %66 = vector.load %arg9[%c0_19, %c0_20] : memref<1x128xf32, #tpu.memory_space<vmem>>, vector<1x128xf32>
    %67 = vector.broadcast %66 : vector<1x128xf32> to vector<8x128xf32>
    %68 = arith.addf %65, %67 : vector<8x128xf32>
    %c0_21 = arith.constant 0 : index
    %c0_22 = arith.constant 0 : index
    %69 = vector.load %arg10[%c0_21, %c0_22] : memref<8x128xf32, #tpu.memory_space<vmem>>, vector<8x128xf32>
    tpu.vector_store %arg10[%c0_21, %c0_22], %68 {strides = array<i32>} : memref<8x128xf32, #tpu.memory_space<vmem>>, vector<8x128xf32>,
    return
  }
  func.func @transform_0(%arg0: i32) -> (i32, i32) {
    %c0_i32 = arith.constant 0 : i32
    %c0_i32_0 = arith.constant 0 : i32
    return %arg0, %c0_i32 : i32, i32
  }
  func.func @transform_1(%arg0: i32) -> (i32, i32) {
    %c0_i32 = arith.constant 0 : i32
    %c0_i32_0 = arith.constant 0 : i32
    return %arg0, %c0_i32 : i32, i32
  }
  func.func @transform_2(%arg0: i32) -> (i32, i32) {
    %c0_i32 = arith.constant 0 : i32
    %c0_i32_0 = arith.constant 0 : i32
    %c0_i32_1 = arith.constant 0 : i32
    return %c0_i32, %c0_i32_0 : i32, i32
  }
  func.func @transform_3(%arg0: i32) -> (i32, i32) {
    %c0_i32 = arith.constant 0 : i32
    %c0_i32_0 = arith.constant 0 : i32
    %c0_i32_1 = arith.constant 0 : i32
    return %c0_i32, %c0_i32_0 : i32, i32
  }
  func.func @transform_4(%arg0: i32) -> (i32, i32) {
    %c0_i32 = arith.constant 0 : i32
    %c0_i32_0 = arith.constant 0 : i32
    %c0_i32_1 = arith.constant 0 : i32
    return %c0_i32, %c0_i32_0 : i32, i32
  }
  func.func @transform_5(%arg0: i32) -> (i32, i32) {
    %c0_i32 = arith.constant 0 : i32
    %c0_i32_0 = arith.constant 0 : i32
    %c0_i32_1 = arith.constant 0 : i32
    return %c0_i32, %c0_i32_0 : i32, i32
  }
  func.func @transform_6(%arg0: i32) -> (i32, i32) {
    %c0_i32 = arith.constant 0 : i32
    %c0_i32_0 = arith.constant 0 : i32
    %c0_i32_1 = arith.constant 0 : i32
    return %c0_i32, %c0_i32_0 : i32, i32
  }
  func.func @transform_7(%arg0: i32) -> (i32, i32) {
    %c0_i32 = arith.constant 0 : i32
    %c0_i32_0 = arith.constant 0 : i32
    %c0_i32_1 = arith.constant 0 : i32
    return %c0_i32, %c0_i32_0 : i32, i32
  }
  func.func @transform_8(%arg0: i32) -> (i32, i32) {
    %c0_i32 = arith.constant 0 : i32
    %c0_i32_0 = arith.constant 0 : i32
    %c0_i32_1 = arith.constant 0 : i32
    return %c0_i32, %c0_i32_0 : i32, i32
  }
  func.func @transform_9(%arg0: i32) -> (i32, i32) {
    %c0_i32 = arith.constant 0 : i32
    %c0_i32_0 = arith.constant 0 : i32
    return %arg0, %c0_i32 : i32, i32
  }
}

</mosaic_0001>

<bundles_post_ra>
// kernel: tpu_custom_call.1
= control target key start
LH: loop header
LB: loop body
LE: loop exit
PB: predicated region body
PF: predicated region fallthrough
CT: control target
= control target key end

     0   :  { %14 = vsyncpa [#allocation3], 0  ;;  %s911_s0 = inlined_call_operand.vmem [shape: bf16[8,128], index: 0, kind: input, shape index: {}]   ;;  %s912_s1 = inlined_call_operand.vmem [shape: s32[8,1], index: 1, kind: input, shape index: {}]   ;;  %s913_s2 = inlined_call_operand.hbm [shape: bf16[128,128], index: 2, kind: input, shape index: {}]   ;;  %s914_s3 = inlined_call_operand.vmem [shape: bf16[8,128], index: 3, kind: input, shape index: {}]   ;;  %s915_s4 = inlined_call_operand.vmem [shape: f32[1,128], index: 4, kind: input, shape index: {}]   ;;  %s916_s5 = inlined_call_operand.hbm [shape: bf16[128,128], index: 5, kind: input, shape index: {}]   ;;  %s917_s6 = inlined_call_operand.vmem [shape: f32[1,128], index: 6, kind: input, shape index: {}]   ;;  %s918_s7 = inlined_call_operand.hbm [shape: bf16[128,128], index: 7, kind: input, shape index: {}]   ;;  %s919_s8 = inlined_call_operand.vmem [shape: f32[1,128], index: 8, kind: input, shape index: {}]   ;;  %s920_s9 = inlined_call_operand.hbm [shape: f32[8,128], index: 9, kind: output, shape index: {}]  }
   0x1   :  { %15 = vsyncpa [#allocation6], 0 }
   0x2   :  { %16 = vsyncpa [#allocation4], 0  ;;  %s736_s30 = smov [#allocation5]   ;;  %s737_s11 = smov [#allocation2]  }
   0x3   :  { %s42_s10 = sshll.u32 %s736_s30, 4  ;;  %s26_s12 = sshll.u32 %s737_s11, 4  ;;  %s43_s10 = int_to_ptr.vmem [resolvable:$true] %s42_s10  ;;  %s795_s12 = int_to_ptr.vmem [resolvable:$true] %s26_s12 }
   0x4   :  { %s642_s15 = scalar_lea.hbm %s916_s5, 1024 }
   0x5   :  { %p643_p0 = scmp.ne.s32.totalorder %s916_s5, %s642_s15  ;;  %p646_p1 = scmp.lt.u32.totalorder %s642_s15, %s916_s5 }
   0x7   :  { %p648_p2 = pnand %p646_p1, %p643_p0 }
   0x9   :  { %651 = shalt.err (!%p648_p2)
}
   0xa   :  { %s652_s20 = scalar_lea.vmem %s43_s10, 1024  ;;  %p657_p4 = scmp.lt.s32.totalorder %s43_s10, %s43_s10 }
   0xb   :  { %p653_p3 = scmp.ne.s32.totalorder %s43_s10, %s652_s20  ;;  %p658_p5 = scmp.lt.s32.totalorder %s652_s20, %s652_s20 }
   0xd   :  { %p659_p6 = por %p658_p5, %p657_p4 }
   0xf   :  { %p660_p7 = pnand %p659_p6, %p653_p3 }
  0x11   :  { %663 = shalt.err (!%p660_p7)
}
  0x12   :  { %s738_s21 = smov 64   ;;  %s739_s22 = smov 4  }
  0x13   :  { %48 = dma.hbm_to_vmem [thread:$0]  %s916_s5, 1024, %s43_s10, [#allocation6], %s738_s21, %s738_s21, %s739_s22  }
  0x14   :  { %s664_s27 = scalar_lea.hbm %s913_s2, 1024 }
  0x15   :  { %p665_p8 = scmp.ne.s32.totalorder %s913_s2, %s664_s27  ;;  %p668_p9 = scmp.lt.u32.totalorder %s664_s27, %s913_s2 }
  0x17   :  { %p670_p10 = pnand %p668_p9, %p665_p8 }
  0x19   :  { %673 = shalt.err (!%p670_p10)
}
  0x1a   :  { %s674_s13 = scalar_lea.vmem %s795_s12, 1024  ;;  %p679_p12 = scmp.lt.s32.totalorder %s795_s12, %s795_s12 }
  0x1b   :  { %p675_p11 = scmp.ne.s32.totalorder %s795_s12, %s674_s13  ;;  %p680_p13 = scmp.lt.s32.totalorder %s674_s13, %s674_s13 }
  0x1d   :  { %p681_p0 = por %p680_p13, %p679_p12 }
  0x1f   :  { %p682_p1 = pnand %p681_p0, %p675_p11 }
  0x21   :  { %685 = shalt.err (!%p682_p1)
}
  0x22   :  { %32 = dma.hbm_to_vmem [thread:$0]  %s913_s2, 1024, %s795_s12, [#allocation3], %s738_s21, %s738_s21, %s739_s22  }
  0x23   :  { %s740_s14 = smov [#allocation7]   ;;  %s686_s18 = scalar_lea.hbm %s918_s7, 1024 }
  0x24   :  { %s56_s15 = sshll.u32 %s740_s14, 4  ;;  %p687_p2 = scmp.ne.s32.totalorder %s918_s7, %s686_s18  ;;  %s57_s15 = int_to_ptr.vmem [resolvable:$true] %s56_s15 }
  0x25   :  { %p690_p3 = scmp.lt.u32.totalorder %s686_s18, %s918_s7 }
  0x27   :  { %p692_p4 = pnand %p690_p3, %p687_p2 }
  0x29   :  { %695 = shalt.err (!%p692_p4)
}
  0x2a   :  { %s696_s25 = scalar_lea.vmem %s57_s15, 1024  ;;  %p701_p6 = scmp.lt.s32.totalorder %s57_s15, %s57_s15 }
  0x2b   :  { %p697_p5 = scmp.ne.s32.totalorder %s57_s15, %s696_s25  ;;  %p702_p7 = scmp.lt.s32.totalorder %s696_s25, %s696_s25 }
  0x2d   :  { %p703_p8 = por %p702_p7, %p701_p6 }
  0x2f   :  { %p704_p9 = pnand %p703_p8, %p697_p5 }
  0x31   :  { %707 = shalt.err (!%p704_p9)
}
  0x32   :  { %62 = dma.hbm_to_vmem [thread:$0]  %s918_s7, 1024, %s57_s15, [#allocation6], %s738_s21, %s738_s21, %s739_s22  }
  0x33   :  { %730 = dma.done.wait [#allocation3], 1024  }
  0x34   :  { %731 = vsyncadd [#allocation3], 4294966272 }
  0x35   :  { %732 = dma.done.wait [#allocation6], 2048  }
  0x36   :  { %733 = vsyncadd [#allocation6], 4294965248  ;;  %v741_v0 = vmov 0.0   ;;  %vm742_vm0 = vmmov 0   ;;  %v743_v1 = vmov 0   ;;  %v618_v2 = vld [vmem:[#allocation2] sm:$0xff]   ;;  %v103_v30 = vlaneseq }
  0x37   :  { %547 = vmatprep.subr.bf16.mxu0 %v741_v0  ;;  %563 = vmatprep.mubr.msk.bf16.mxu0 %vm742_vm0, %v741_v0  ;;  %v619_v3 = vld [vmem:[#allocation2 + $0x8] sm:$0xff]   ;;  %v620_v4 = vld [vmem:[#allocation2 + $0x10] sm:$0xff]   ;;  %v76_v5 = vld [vmem:[%s912_s1] sm:$0xff]  ;;  %s744_s11 = smov [#allocation8]  }
  0x38   :  { %616 = vset.pattern.permute.xlu0 %v743_v1  ;;  %617 = vset.pattern.permute.xlu1 %v743_v1  ;;  %vm95_vm1 = vcmp.eq.s32.totalorder %v76_v5, 0  ;;  %vm210_vm2 = vcmp.eq.s32.totalorder %v76_v5, 2  ;;  %vm196_vm3 = vcmp.eq.s32.totalorder %v76_v5, 1  ;;  %v621_v6 = vld [vmem:[#allocation2 + $0x18] sm:$0xff]   ;;  %vm224_vm4 = vcmp.eq.s32.totalorder %v76_v5, 3  ;;  %v626_v9 = vld [vmem:[#allocation5] sm:$0xff]  }
  0x39   :  { %567 = vmatprep.subr.bf16.mxu1 %v741_v0  ;;  %583 = vmatprep.mubr.msk.bf16.mxu1 %vm742_vm0, %v741_v0  ;;  %v489_v7 = vsel %vm95_vm1, 1.0, %v741_v0  ;;  %v499_v8 = vsel %vm210_vm2, 1.0, %v741_v0  ;;  %v498_v10 = vsel %vm196_vm3, 1.0, %v741_v0  ;;  %v627_v11 = vld [vmem:[#allocation5 + $0x8] sm:$0xff]   ;;  %v622_v12 = vld [vmem:[#allocation2 + $0x20] sm:$0xff]   ;;  %v500_v13 = vsel %vm224_vm4, 1.0, %v741_v0 }
  0x3a   :  { %548 = vmatpush3.bf16.msra.mxu0 %v618_v2  ;;  %100 = vperm.xlu0 %616, %v489_v7   ;;  %v628_v14 = vld [vmem:[#allocation5 + $0x10] sm:$0xff]   ;;  %v623_v15 = vld [vmem:[#allocation2 + $0x28] sm:$0xff]   ;;  %v629_v16 = vld [vmem:[#allocation5 + $0x18] sm:$0xff]   ;;  %v104_v31 = vshrl.u32 %v103_v30, 7  ;;  %s479_s13 = sshll.u32 %s744_s11, 4  ;;  %s480_s13 = int_to_ptr.vmem [resolvable:$true] %s479_s13 }
  0x3b   :  { %549 = vmatprep.subr.bf16.mxu0 %v741_v0  ;;  %215 = vperm.xlu1 %617, %v499_v8   ;;  %v624_v17 = vld [vmem:[#allocation2 + $0x30] sm:$0xff]   ;;  %v630_v18 = vld [vmem:[#allocation5 + $0x20] sm:$0xff]   ;;  %v625_v19 = vld [vmem:[#allocation2 + $0x38] sm:$0xff]   ;;  %p713_p11 = scmp.lt.s32.totalorder %s480_s13, %s480_s13 }
  0x3c   :  { %568 = vmatpush3.bf16.msra.mxu1 %v626_v9  ;;  %v75_v20 = vld [vmem:[%s911_s0] sm:$0xf]  ;;  %v631_v21 = vld [vmem:[#allocation5 + $0x28] sm:$0xff]   ;;  %v632_v22 = vld [vmem:[#allocation5 + $0x30] sm:$0xff]   ;;  %v105_v34 = vsub.s32 0, %v104_v31  ;;  %v206_v36 = vsub.s32 1, %v104_v31 }
  0x3d   :  { %569 = vmatprep.subr.bf16.mxu1 %v741_v0  ;;  %v633_v23 = vld [vmem:[#allocation5 + $0x38] sm:$0xff]   ;;  %v634_v24 = vld [vmem:[#allocation7] sm:$0xff]   ;;  %v635_v25 = vld [vmem:[#allocation7 + $0x8] sm:$0xff]   ;;  %v220_v38 = vsub.s32 2, %v104_v31  ;;  %v234_v41 = vsub.s32 3, %v104_v31 }
  0x3e   :  { %550 = vmatpush3.bf16.msra.mxu0 %v619_v3  ;;  %201 = vperm.xlu0 %616, %v498_v10   ;;  %v636_v26 = vld [vmem:[#allocation7 + $0x10] sm:$0xff]   ;;  %v637_v27 = vld [vmem:[#allocation7 + $0x18] sm:$0xff]   ;;  %v638_v28 = vld [vmem:[#allocation7 + $0x20] sm:$0xff]  }
  0x3f   :  { %551 = vmatprep.subr.bf16.mxu0 %v741_v0  ;;  %229 = vperm.xlu1 %617, %v500_v13   ;;  %v639_v29 = vld [vmem:[#allocation7 + $0x28] sm:$0xff]   ;;  %v93_v32 = vld [vmem:[%s914_s3] sm:$0xf]  ;;  %v640_v62 = vld [vmem:[#allocation7 + $0x30] sm:$0xff]  }
  0x40   :  { %570 = vmatpush3.bf16.msra.mxu1 %v627_v11  ;;  %v94_v33 = vunpack.c.l.bf16 %v93_v32  ;;  %v501_v57 = vld [vmem:[%s915_s4] ss:$0 sm:$0xff]  ;;  %v641_v63 = vld [vmem:[#allocation7 + $0x38] sm:$0xff]  }
  0x41   :  { %571 = vmatprep.subr.bf16.mxu1 %v741_v0  ;;  %v502_v1 = vld [vmem:[%s917_s6] ss:$0 sm:$0xff]  ;;  %s708_s6 = scalar_lea.vmem %s480_s13, 128 }
  0x42   :  { %552 = vmatpush3.bf16.msra.mxu0 %v620_v4  ;;  %v106_v37 = vrot.slane %v94_v33, %v105_v34  ;;  %v207_v40 = vrot.slane %v94_v33, %v206_v36  ;;  %v221_v44 = vrot.slane %v94_v33, %v220_v38  ;;  %v235_v47 = vrot.slane %v94_v33, %v234_v41  ;;  %v511_v9 = vld [vmem:[%s919_s8] ss:$0 sm:$0xff]  ;;  %p709_p10 = scmp.ne.s32.totalorder %s480_s13, %s708_s6  ;;  %p714_p12 = scmp.lt.s32.totalorder %s708_s6, %s708_s6 }
  0x43   :  { %553 = vmatprep.subr.bf16.mxu0 %v741_v0 }
  0x44   :  { %572 = vmatpush3.bf16.msra.mxu1 %v628_v14  ;;  %p715_p13 = por %p714_p12, %p713_p11 }
  0x45   :  { %573 = vmatprep.subr.bf16.mxu1 %v741_v0 }
  0x46   :  { %554 = vmatpush3.bf16.msra.mxu0 %v621_v6  ;;  %p716_p0 = pnand %p715_p13, %p709_p10 }
  0x47   :  { %555 = vmatprep.subr.bf16.mxu0 %v741_v0 }
  0x48   :  { %574 = vmatpush3.bf16.msra.mxu1 %v629_v16 }
  0x49   :  { %575 = vmatprep.subr.bf16.mxu1 %v741_v0 }
  0x4a   :  { %556 = vmatpush3.bf16.msra.mxu0 %v622_v12 }
  0x4b   :  { %557 = vmatprep.subr.bf16.mxu0 %v741_v0 }
  0x4c   :  { %576 = vmatpush3.bf16.msra.mxu1 %v630_v18 }
  0x4d   :  { %577 = vmatprep.subr.bf16.mxu1 %v741_v0 }
  0x4e   :  { %558 = vmatpush3.bf16.msra.mxu0 %v623_v15 }
  0x4f   :  { %559 = vmatprep.subr.bf16.mxu0 %v741_v0 }
  0x50   :  { %578 = vmatpush3.bf16.msra.mxu1 %v631_v21 }
  0x51   :  { %579 = vmatprep.subr.bf16.mxu1 %v741_v0 }
  0x52   :  { %560 = vmatpush3.bf16.msra.mxu0 %v624_v17 }
  0x53   :  { %561 = vmatprep.subr.bf16.mxu0 %v741_v0 }
  0x54   :  { %580 = vmatpush3.bf16.msra.mxu1 %v632_v22 }
  0x55   :  { %581 = vmatprep.subr.bf16.mxu1 %v741_v0 }
  0x56   :  { %562 = vmatpush3.bf16.msra.mxu0 %v625_v19 }
  0x57   :  { %587 = vmatprep.subr.bf16.mxu0 %v741_v0 }
  0x58   :  { %582 = vmatpush3.bf16.msra.mxu1 %v633_v23 }
  0x59   :  { %564 = vmatmul.mubr.bf16.vlgmr.msra.gmra.mrb[0].mxu0 %v75_v20 }
  0x5a   :  { %603 = vmatprep.mubr.msk.bf16.mxu0 %vm742_vm0, %v741_v0  ;;  %588 = vmatpush3.bf16.msra.mxu0 %v634_v24 }
  0x5b   :  { %589 = vmatprep.subr.bf16.mxu0 %v741_v0 }
  0x5e   :  { %590 = vmatpush3.bf16.msra.mxu0 %v635_v25 }
  0x5f   :  { %591 = vmatprep.subr.bf16.mxu0 %v741_v0 }
  0x62   :  { %592 = vmatpush3.bf16.msra.mxu0 %v636_v26 }
  0x63   :  { %593 = vmatprep.subr.bf16.mxu0 %v741_v0 }
  0x66   :  { %594 = vmatpush3.bf16.msra.mxu0 %v637_v27 }
  0x67   :  { %595 = vmatprep.subr.bf16.mxu0 %v741_v0 }
  0x6a   :  { %596 = vmatpush3.bf16.msra.mxu0 %v638_v28 }
  0x6b   :  { %597 = vmatprep.subr.bf16.mxu0 %v741_v0 }
  0x6e   :  { %598 = vmatpush3.bf16.msra.mxu0 %v639_v29 }
  0x6f   :  { %599 = vmatprep.subr.bf16.mxu0 %v741_v0 }
  0x72   :  { %600 = vmatpush3.bf16.msra.mxu0 %v640_v62 }
  0x73   :  { %601 = vmatprep.subr.bf16.mxu0 %v741_v0 }
  0x76   :  { %602 = vmatpush3.bf16.msra.mxu0 %v641_v63 }
  0xb9   :  { %v101_v35 = vpop.permute.xlu0 %100 }
  0xba   :  { %v216_v39 = vpop.permute.xlu1 %215  ;;  %v107_v43 = vmul.f32 %v106_v37, %v101_v35 }
  0xbb   :  { %v222_v52 = vmul.f32 %v221_v44, %v216_v39 }
  0xbd   :  { %v202_v42 = vpop.permute.xlu0 %201 }
  0xbe   :  { %v208_v46 = vmul.f32 %v207_v40, %v202_v42  ;;  %v230_v50 = vpop.permute.xlu1 %229 }
  0xbf   :  { %v236_v55 = vmul.f32 %v235_v47, %v230_v50 }
 0x12c   :  { %v190_v45 = vpop.f32.mrb[0].mxu0 }
 0x12d   :  { %v191_v48 = vadd.f32 %v190_v45, %v107_v43  ;;  %v565_v49 = vpop.f32.mrb[1].mxu0 }
 0x12e   :  { %v193_v51 = vpop.f32.mrb[2].mxu0 }
 0x12f   :  { %v209_v53 = vadd.f32 %v208_v46, %v191_v48  ;;  %v566_v54 = vpop.f32.mrb[3].mxu0 }
 0x131   :  { %v223_v56 = vadd.f32 %v222_v52, %v209_v53 }
 0x133   :  { %v237_v58 = vadd.f32 %v236_v55, %v223_v56 }
 0x135   :  { %v245_v59 = vadd.f32 %v501_v57, %v237_v58 }
 0x137   :  { %v246_v60 = vmax.f32 %v245_v59, 0.0 }
 0x139   :  { %v247_v61 = vpack.c.bf16 %v246_v60, %v246_v60 }
 0x13b   :  { %584 = vmatmul.mubr.bf16.vlgmr.msra.gmra.mrb[0].mxu1 %v247_v61 }
 0x20e   :  { %v353_v2 = vpop.f32.mrb[0].mxu1 }
 0x20f   :  { %v354_v3 = vadd.f32 %v502_v1, %v353_v2  ;;  %v585_v4 = vpop.f32.mrb[1].mxu1 }
 0x210   :  { %v356_v5 = vpop.f32.mrb[2].mxu1 }
 0x211   :  { %v359_v6 = vmax.f32 %v354_v3, 0.0  ;;  %v586_v7 = vpop.f32.mrb[3].mxu1 }
 0x213   :  { %v360_v8 = vpack.c.bf16 %v359_v6, %v359_v6 }
 0x215   :  { %604 = vmatmul.mubr.bf16.vlgmr.msra.gmra.mrb[4].mxu0 %v360_v8 }
 0x2e8   :  { %v466_v0 = vpop.f32.mrb[4].mxu0 }
 0x2e9   :  { %v467_v10 = vadd.f32 %v511_v9, %v466_v0  ;;  %v605_v11 = vpop.f32.mrb[5].mxu0 }
 0x2ea   :  { %v469_v12 = vpop.f32.mrb[6].mxu0 }
 0x2eb   :  { %472 = vst [vmem:[#allocation8] sm:$0xff] %v467_v10  ;;  %v606_v13 = vpop.f32.mrb[7].mxu0 }
 0x2ec   :  { %719 = shalt.err (!%p716_p0)
}
 0x2ed   :  { %s720_s8 = scalar_lea.hbm %s920_s9, 128 }
 0x2ee   :  { %p721_p1 = scmp.ne.s32.totalorder %s920_s9, %s720_s8  ;;  %p724_p2 = scmp.lt.u32.totalorder %s720_s8, %s920_s9 }
 0x2f0   :  { %p726_p3 = pnand %p724_p2, %p721_p1 }
 0x2f2   :  { %729 = shalt.err (!%p726_p3)
}
 0x2f3   :  { %482 = dma.vmem_to_hbm [thread:$0]  %s480_s13, 128, %s920_s9, [#allocation4]  }
 0x2f4   :  { %734 = dma.done.wait [#allocation4], 128  }
 0x2f5   :  { %735 = vsyncadd [#allocation4], 4294967168 }
 0x2f6   :  { %486 = vsyncpa [#allocation3], 1 }
 0x2f7   :  { %487 = vsyncpa [#allocation6], 1 }
 0x2f8   :  { %488 = vsyncpa [#allocation4], 1 }

</bundles_post_ra>
